<compile_context>
chip_gen: v7x
topology: tpu7x:2x2x1
jax: 0.10.0
libtpu: 0.0.40
codegen_flags: <defaults>
</compile_context>

<pallas_src>
import functools
from math import sqrt

import jax
import jax.numpy as jnp
from jax import lax
from jax.experimental import pallas as pl
from jax.experimental.pallas import tpu as pltpu


# ---------------------------------------------------------------------------
# Fused kernel: one (batch, L-tile, head) triple per grid step.
# Output projection is accumulated across the head axis (innermost, arbitrary).
# ---------------------------------------------------------------------------
def _head_attention_kernel(xq_ref, xk_ref, xv_ref,
                           wq_ref, bq_ref, wk_ref, bk_ref,
                           wv_ref, bv_ref, wo_ref, bo_ref,
                           o_ref, acc_ref, *, scale):
    h = pl.program_id(2)

    # bf16 MXU operands; accumulation in f32.
    xq = xq_ref[...].astype(jnp.bfloat16)          # (tl, d_model)
    xk = xk_ref[...].astype(jnp.bfloat16)          # (S,  d_model)
    xv = xv_ref[...].astype(jnp.bfloat16)          # (S,  d_model)

    # Per-head projections (weights arrive as bf16, biases f32).
    q = jnp.dot(xq, wq_ref[...], preferred_element_type=jnp.float32) + bq_ref[...]  # (tl, dk)
    k = jnp.dot(xk, wk_ref[...], preferred_element_type=jnp.float32) + bk_ref[...]  # (S,  dk)
    v = jnp.dot(xv, wv_ref[...], preferred_element_type=jnp.float32) + bv_ref[...]  # (S,  dv)

    # scores = q @ k^T (contract on d_k, no explicit transpose of K).
    s = lax.dot_general(q.astype(jnp.bfloat16), k.astype(jnp.bfloat16),
                        (((1,), (1,)), ((), ())),
                        preferred_element_type=jnp.float32) * scale                 # (tl, S) f32

    # Softmax in f32 (exact division; v5e has no bf16 VPU/EUP).
    s = s - jnp.max(s, axis=-1, keepdims=True)
    p = jnp.exp(s)
    p = p / jnp.sum(p, axis=-1, keepdims=True)

    head_out = jnp.dot(p.astype(jnp.bfloat16), v.astype(jnp.bfloat16),
                       preferred_element_type=jnp.float32)                          # (tl, dv) f32

    @pl.when(h == 0)
    def _():
        acc_ref[...] = jnp.zeros_like(acc_ref)

    # Accumulate this head's slice of the output projection.
    # (acc += dot(...) form: accumulate-in-place friendly on v7x's MRB.)
    acc_ref[...] += jnp.dot(head_out.astype(jnp.bfloat16), wo_ref[...],
                            preferred_element_type=jnp.float32)                     # (tl, d_model)

    @pl.when(h == pl.num_programs(2) - 1)
    def _():
        o_ref[...] = (acc_ref[...] + bo_ref[...]).astype(o_ref.dtype)


# ---------------------------------------------------------------------------
# AttentionLayer forward: single fused pallas_call.
# ---------------------------------------------------------------------------
def attention_layer_forward(params, queries, keys, values, atten_data=None,
                            attn_mask=None, n_heads=4, mix=False):
    # TODO(synk): atten_data / attn_mask unused (default unmasked FullAttention).
    if mix:
        # TODO(synk): mix=True reproduces PyTorch's transpose(2,1).view scramble
        #             (mixes L and H axes); not supported by the fused kernel.
        raise NotImplementedError("mix=True is not supported by this kernel")

    B, L, d_model = queries.shape
    _, S, _ = keys.shape
    H = n_heads
    hk = params["wq"].shape[1]          # H * d_k
    hv = params["wv"].shape[1]          # H * d_v
    d_out = params["wo"].shape[1]       # d_model
    d_k = hk // H
    d_v = hv // H
    scale = 1.0 / sqrt(d_k)

    # One-time, head-major, bf16 weight layouts (outside the kernel): every
    # grid step DMAs a full (d_in, d_head) tile — no in-kernel lane slicing.
    wq_h = params["wq"].reshape(d_model, H, d_k).transpose(1, 0, 2).astype(jnp.bfloat16)
    wk_h = params["wk"].reshape(d_model, H, d_k).transpose(1, 0, 2).astype(jnp.bfloat16)
    wv_h = params["wv"].reshape(d_model, H, d_v).transpose(1, 0, 2).astype(jnp.bfloat16)
    wo_h = params["wo"].reshape(H, d_v, d_out).astype(jnp.bfloat16)
    bq_h = params["bq"].reshape(H, 1, d_k).astype(jnp.float32)
    bk_h = params["bk"].reshape(H, 1, d_k).astype(jnp.float32)
    bv_h = params["bv"].reshape(H, 1, d_v).astype(jnp.float32)
    bo_2 = params["bo"].reshape(1, d_out).astype(jnp.float32)

    # L tile: full rows at small L; 128-row tiles once L is a large multiple
    # of 128 (bounds per-step VMEM — matters on v7x's 64 MiB).
    tl = 128 if (L > 128 and L % 128 == 0) else L
    grid = (B, L // tl, H)

    kern = functools.partial(_head_attention_kernel, scale=scale)

    out = pl.pallas_call(
        kern,
        out_shape=jax.ShapeDtypeStruct((B, L, d_out), queries.dtype),
        grid=grid,
        in_specs=[
            pl.BlockSpec((None, tl, d_model), lambda b, l, h: (b, l, 0)),   # queries
            pl.BlockSpec((None, S, d_model), lambda b, l, h: (b, 0, 0)),    # keys
            pl.BlockSpec((None, S, d_model), lambda b, l, h: (b, 0, 0)),    # values
            pl.BlockSpec((None, d_model, d_k), lambda b, l, h: (h, 0, 0)),  # wq (head h)
            pl.BlockSpec((None, 1, d_k), lambda b, l, h: (h, 0, 0)),        # bq (head h)
            pl.BlockSpec((None, d_model, d_k), lambda b, l, h: (h, 0, 0)),  # wk (head h)
            pl.BlockSpec((None, 1, d_k), lambda b, l, h: (h, 0, 0)),        # bk (head h)
            pl.BlockSpec((None, d_model, d_v), lambda b, l, h: (h, 0, 0)),  # wv (head h)
            pl.BlockSpec((None, 1, d_v), lambda b, l, h: (h, 0, 0)),        # bv (head h)
            pl.BlockSpec((None, d_v, d_out), lambda b, l, h: (h, 0, 0)),    # wo (head h rows)
            pl.BlockSpec((1, d_out), lambda b, l, h: (0, 0)),               # bo
        ],
        out_specs=pl.BlockSpec((None, tl, d_out), lambda b, l, h: (b, l, 0)),
        scratch_shapes=[pltpu.VMEM((tl, d_out), jnp.float32)],              # head accumulator
        compiler_params=pltpu.CompilerParams(
            dimension_semantics=("parallel", "parallel", "arbitrary"),
            vmem_limit_bytes=32 * 1024 * 1024),
    )(queries, keys, values,
      wq_h, bq_h, wk_h, bk_h, wv_h, bv_h, wo_h, bo_2)

    return out, None  # FullAttention(output_attention=False) returns attn=None


# ---------------------------------------------------------------------------
# Pure-JAX references for verification.
#   bf16_mxu=True mirrors the kernel's bf16 MXU operand casts exactly.
# ---------------------------------------------------------------------------
def reference_forward(params, queries, keys, values, n_heads=4, bf16_mxu=False):
    B, L, _ = queries.shape
    _, S, _ = keys.shape
    H = n_heads
    cast = (lambda x: x.astype(jnp.bfloat16)) if bf16_mxu else (lambda x: x)
    f32 = jnp.float32

    q = jnp.einsum("bld,dk->blk", cast(queries), cast(params["wq"]),
                   preferred_element_type=f32) + params["bq"]
    k = jnp.einsum("bsd,dk->bsk", cast(keys), cast(params["wk"]),
                   preferred_element_type=f32) + params["bk"]
    v = jnp.einsum("bsd,dk->bsk", cast(values), cast(params["wv"]),
                   preferred_element_type=f32) + params["bv"]
    d_k = q.shape[-1] // H
    d_v = v.shape[-1] // H
    q = q.reshape(B, L, H, d_k)
    k = k.reshape(B, S, H, d_k)
    v = v.reshape(B, S, H, d_v)
    s = jnp.einsum("blhe,bshe->bhls", cast(q), cast(k),
                   preferred_element_type=f32) / sqrt(d_k)
    a = jax.nn.softmax(s, axis=-1)
    out = jnp.einsum("bhls,bshd->blhd", cast(a), cast(v),
                     preferred_element_type=f32).reshape(B, L, H * d_v)
    return jnp.einsum("blk,kd->bld", cast(out), cast(params["wo"]),
                      preferred_element_type=f32) + params["bo"]


# ---------------------------------------------------------------------------
if __name__ == "__main__":
    B, L, S = 2, 8, 8
    d_model, n_heads = 32, 4
    d_keys = d_values = d_model // n_heads

    key = jax.random.PRNGKey(0)
    ks = jax.random.split(key, 12)
    init = lambda k, shape, fan_in: (jax.random.uniform(k, shape, jnp.float32,
                                                        -1.0, 1.0) / sqrt(fan_in))

    params = {
        "wq": init(ks[0], (d_model, d_keys * n_heads), d_model),
        "bq": init(ks[1], (d_keys * n_heads,), d_model),
        "wk": init(ks[2], (d_model, d_keys * n_heads), d_model),
        "bk": init(ks[3], (d_keys * n_heads,), d_model),
        "wv": init(ks[4], (d_model, d_values * n_heads), d_model),
        "bv": init(ks[5], (d_values * n_heads,), d_model),
        "wo": init(ks[6], (d_values * n_heads, d_model), d_values * n_heads),
        "bo": init(ks[7], (d_model,), d_values * n_heads),
    }

    queries = jax.random.normal(ks[8], (B, L, d_model), jnp.float32)
    keys_in = jax.random.normal(ks[9], (B, S, d_model), jnp.float32)
    values_in = jax.random.normal(ks[10], (B, S, d_model), jnp.float32)
    atten_data = jax.random.normal(ks[11], (B, L, S), jnp.float32)  # unused (TODO)

    out, attn = attention_layer_forward(params, queries, keys_in, values_in,
                                        atten_data=atten_data, attn_mask=None,
                                        n_heads=n_heads, mix=False)
    out = jax.block_until_ready(out)

    assert out.shape == (B, L, d_model)
    assert attn is None

    # Tight check vs a reference that emulates the kernel's bf16 MXU operands.
    ref_bf16 = reference_forward(params, queries, keys_in, values_in,
                                 n_heads=n_heads, bf16_mxu=True)
    assert jnp.allclose(out, ref_bf16, atol=2e-3, rtol=2e-3), \
        "mismatch vs bf16-emulating reference"

    # Loose semantic check vs the full-f32 PyTorch-equivalent math
    # (difference dominated by the bf16 MXU operand quantization).
    ref_f32 = reference_forward(params, queries, keys_in, values_in,
                                n_heads=n_heads, bf16_mxu=False)
    assert jnp.allclose(out, ref_f32, atol=6e-2, rtol=6e-2), \
        "mismatch vs f32 reference"

    print("KERNEL_OK")
</pallas_src>

<mosaic_0001>
module attributes {stable_mosaic.version = 11 : i64} {
  func.func @_head_attention_kernel(%arg0: i32, %arg1: i32, %arg2: i32, %arg3: memref<1x8x32xf32, #tpu.memory_space<vmem>>, %arg4: memref<1x8x32xf32, #tpu.memory_space<vmem>>, %arg5: memref<1x8x32xf32, #tpu.memory_space<vmem>>, %arg6: memref<1x32x8xbf16, #tpu.memory_space<vmem>>, %arg7: memref<1x1x8xf32, #tpu.memory_space<vmem>>, %arg8: memref<1x32x8xbf16, #tpu.memory_space<vmem>>, %arg9: memref<1x1x8xf32, #tpu.memory_space<vmem>>, %arg10: memref<1x32x8xbf16, #tpu.memory_space<vmem>>, %arg11: memref<1x1x8xf32, #tpu.memory_space<vmem>>, %arg12: memref<1x8x32xbf16, #tpu.memory_space<vmem>>, %arg13: memref<1x32xf32, #tpu.memory_space<vmem>>, %arg14: memref<1x8x32xf32, #tpu.memory_space<vmem>>, %arg15: memref<8x32xf32, #tpu.memory_space<vmem>>) attributes {dimension_semantics = [#tpu.dimension_semantics<parallel>, #tpu.dimension_semantics<parallel>, #tpu.dimension_semantics<arbitrary>], iteration_bounds = array<i64: 2, 1, 4>, scalar_prefetch = 0 : i64, scratch_operands = 1 : i64, tpu.core_type = #tpu.core_type<tc>, window_params = [{transform_indices = @transform_0, window_bounds = array<i64: 1, 8, 32>}, {transform_indices = @transform_1, window_bounds = array<i64: 1, 8, 32>}, {transform_indices = @transform_2, window_bounds = array<i64: 1, 8, 32>}, {transform_indices = @transform_3, window_bounds = array<i64: 1, 32, 8>}, {transform_indices = @transform_4, window_bounds = array<i64: 1, 1, 8>}, {transform_indices = @transform_5, window_bounds = array<i64: 1, 32, 8>}, {transform_indices = @transform_6, window_bounds = array<i64: 1, 1, 8>}, {transform_indices = @transform_7, window_bounds = array<i64: 1, 32, 8>}, {transform_indices = @transform_8, window_bounds = array<i64: 1, 1, 8>}, {transform_indices = @transform_9, window_bounds = array<i64: 1, 8, 32>}, {pipeline_mode = #tpu.pipeline_mode<synchronous>, transform_indices = @transform_10, window_bounds = array<i64: 1, 32>}, {transform_indices = @transform_11, window_bounds = array<i64: 1, 8, 32>}]} {
    %c0 = arith.constant 0 : index
    %c0_0 = arith.constant 0 : index
    %c0_1 = arith.constant 0 : index
    %0 = vector.load %arg3[%c0, %c0_0, %c0_1] : memref<1x8x32xf32, #tpu.memory_space<vmem>>, vector<1x8x32xf32>
    %1 = vector.shape_cast %0 : vector<1x8x32xf32> to vector<8x32xf32>
    %2 = arith.truncf %1 : vector<8x32xf32> to vector<8x32xbf16>
    %c0_2 = arith.constant 0 : index
    %c0_3 = arith.constant 0 : index
    %c0_4 = arith.constant 0 : index
    %3 = vector.load %arg4[%c0_2, %c0_3, %c0_4] : memref<1x8x32xf32, #tpu.memory_space<vmem>>, vector<1x8x32xf32>
    %4 = vector.shape_cast %3 : vector<1x8x32xf32> to vector<8x32xf32>
    %5 = arith.truncf %4 : vector<8x32xf32> to vector<8x32xbf16>
    %c0_5 = arith.constant 0 : index
    %c0_6 = arith.constant 0 : index
    %c0_7 = arith.constant 0 : index
    %6 = vector.load %arg5[%c0_5, %c0_6, %c0_7] : memref<1x8x32xf32, #tpu.memory_space<vmem>>, vector<1x8x32xf32>
    %7 = vector.shape_cast %6 : vector<1x8x32xf32> to vector<8x32xf32>
    %8 = arith.truncf %7 : vector<8x32xf32> to vector<8x32xbf16>
    %c0_8 = arith.constant 0 : index
    %c0_9 = arith.constant 0 : index
    %c0_10 = arith.constant 0 : index
    %9 = vector.load %arg6[%c0_8, %c0_9, %c0_10] : memref<1x32x8xbf16, #tpu.memory_space<vmem>>, vector<1x32x8xbf16>
    %10 = vector.shape_cast %9 : vector<1x32x8xbf16> to vector<32x8xbf16>
    %cst = arith.constant dense<0.000000e+00> : vector<8x8xf32>
    %11 = tpu.matmul %2, %10, %cst {dimension_numbers = #tpu.dot_dimension_numbers<[1], [0], [0], [1], [0, 0, 1, 1], [], []>} : vector<8x32xbf16>, vector<32x8xbf16>, vector<8x8xf32> -> vector<8x8xf32>
    %c0_11 = arith.constant 0 : index
    %c0_12 = arith.constant 0 : index
    %c0_13 = arith.constant 0 : index
    %12 = vector.load %arg7[%c0_11, %c0_12, %c0_13] : memref<1x1x8xf32, #tpu.memory_space<vmem>>, vector<1x1x8xf32>
    %13 = vector.shape_cast %12 : vector<1x1x8xf32> to vector<1x8xf32>
    %14 = vector.broadcast %13 : vector<1x8xf32> to vector<8x8xf32>
    %15 = arith.addf %11, %14 : vector<8x8xf32>
    %c0_14 = arith.constant 0 : index
    %c0_15 = arith.constant 0 : index
    %c0_16 = arith.constant 0 : index
    %16 = vector.load %arg8[%c0_14, %c0_15, %c0_16] : memref<1x32x8xbf16, #tpu.memory_space<vmem>>, vector<1x32x8xbf16>
    %17 = vector.shape_cast %16 : vector<1x32x8xbf16> to vector<32x8xbf16>
    %cst_17 = arith.constant dense<0.000000e+00> : vector<8x8xf32>
    %18 = tpu.matmul %5, %17, %cst_17 {dimension_numbers = #tpu.dot_dimension_numbers<[1], [0], [0], [1], [0, 0, 1, 1], [], []>} : vector<8x32xbf16>, vector<32x8xbf16>, vector<8x8xf32> -> vector<8x8xf32>
    %c0_18 = arith.constant 0 : index
    %c0_19 = arith.constant 0 : index
    %c0_20 = arith.constant 0 : index
    %19 = vector.load %arg9[%c0_18, %c0_19, %c0_20] : memref<1x1x8xf32, #tpu.memory_space<vmem>>, vector<1x1x8xf32>
    %20 = vector.shape_cast %19 : vector<1x1x8xf32> to vector<1x8xf32>
    %21 = vector.broadcast %20 : vector<1x8xf32> to vector<8x8xf32>
    %22 = arith.addf %18, %21 : vector<8x8xf32>
    %c0_21 = arith.constant 0 : index
    %c0_22 = arith.constant 0 : index
    %c0_23 = arith.constant 0 : index
    %23 = vector.load %arg10[%c0_21, %c0_22, %c0_23] : memref<1x32x8xbf16, #tpu.memory_space<vmem>>, vector<1x32x8xbf16>
    %24 = vector.shape_cast %23 : vector<1x32x8xbf16> to vector<32x8xbf16>
    %cst_24 = arith.constant dense<0.000000e+00> : vector<8x8xf32>
    %25 = tpu.matmul %8, %24, %cst_24 {dimension_numbers = #tpu.dot_dimension_numbers<[1], [0], [0], [1], [0, 0, 1, 1], [], []>} : vector<8x32xbf16>, vector<32x8xbf16>, vector<8x8xf32> -> vector<8x8xf32>
    %c0_25 = arith.constant 0 : index
    %c0_26 = arith.constant 0 : index
    %c0_27 = arith.constant 0 : index
    %26 = vector.load %arg11[%c0_25, %c0_26, %c0_27] : memref<1x1x8xf32, #tpu.memory_space<vmem>>, vector<1x1x8xf32>
    %27 = vector.shape_cast %26 : vector<1x1x8xf32> to vector<1x8xf32>
    %28 = vector.broadcast %27 : vector<1x8xf32> to vector<8x8xf32>
    %29 = arith.addf %25, %28 : vector<8x8xf32>
    %30 = arith.truncf %15 : vector<8x8xf32> to vector<8x8xbf16>
    %31 = arith.truncf %22 : vector<8x8xf32> to vector<8x8xbf16>
    %cst_28 = arith.constant dense<0.000000e+00> : vector<8x8xf32>
    %32 = tpu.matmul %30, %31, %cst_28 {dimension_numbers = #tpu.dot_dimension_numbers<[1], [1], [0], [0], [0, 0, 1, 0], [], []>} : vector<8x8xbf16>, vector<8x8xbf16>, vector<8x8xf32> -> vector<8x8xf32>
    %cst_29 = arith.constant 0.353553385 : f32
    %33 = vector.broadcast %cst_29 : f32 to vector<8x8xf32>
    %34 = arith.mulf %32, %33 : vector<8x8xf32>
    %cst_30 = arith.constant dense<0xFF800000> : vector<8xf32>
    %35 = vector.multi_reduction <maximumf>, %34, %cst_30 [1] : vector<8x8xf32> to vector<8xf32>
    %36 = vector.shape_cast %35 : vector<8xf32> to vector<8x1xf32>
    %37 = vector.broadcast %36 : vector<8x1xf32> to vector<8x8xf32>
    %38 = arith.subf %34, %37 : vector<8x8xf32>
    %39 = math.exp %38 : vector<8x8xf32>
    %cst_31 = arith.constant dense<0.000000e+00> : vector<8xf32>
    %40 = vector.multi_reduction <add>, %39, %cst_31 [1] : vector<8x8xf32> to vector<8xf32>
    %41 = vector.shape_cast %40 : vector<8xf32> to vector<8x1xf32>
    %42 = vector.broadcast %41 : vector<8x1xf32> to vector<8x8xf32>
    %43 = arith.divf %39, %42 : vector<8x8xf32>
    %44 = arith.truncf %43 : vector<8x8xf32> to vector<8x8xbf16>
    %45 = arith.truncf %29 : vector<8x8xf32> to vector<8x8xbf16>
    %cst_32 = arith.constant dense<0.000000e+00> : vector<8x8xf32>
    %46 = tpu.matmul %44, %45, %cst_32 {dimension_numbers = #tpu.dot_dimension_numbers<[1], [0], [0], [1], [0, 0, 1, 1], [], []>} : vector<8x8xbf16>, vector<8x8xbf16>, vector<8x8xf32> -> vector<8x8xf32>
    %c0_i32 = arith.constant 0 : i32
    %47 = arith.cmpi eq, %arg2, %c0_i32 : i32
    %48 = arith.extui %47 : i1 to i32
    %c0_i32_33 = arith.constant 0 : i32
    %49 = arith.cmpi ne, %48, %c0_i32_33 : i32
    scf.if %49 {
      %cst_43 = arith.constant 0.000000e+00 : f32
      %60 = vector.broadcast %cst_43 : f32 to vector<8x32xf32>
      %c0_44 = arith.constant 0 : index
      %c0_45 = arith.constant 0 : index
      %61 = vector.load %arg15[%c0_44, %c0_45] : memref<8x32xf32, #tpu.memory_space<vmem>>, vector<8x32xf32>
      tpu.vector_store %arg15[%c0_44, %c0_45], %60 {strides = array<i32>} : memref<8x32xf32, #tpu.memory_space<vmem>>, vector<8x32xf32>,
    } else {
    }
    %c0_34 = arith.constant 0 : index
    %c0_35 = arith.constant 0 : index
    %50 = vector.load %arg15[%c0_34, %c0_35] : memref<8x32xf32, #tpu.memory_space<vmem>>, vector<8x32xf32>
    %51 = arith.truncf %46 : vector<8x8xf32> to vector<8x8xbf16>
    %c0_36 = arith.constant 0 : index
    %c0_37 = arith.constant 0 : index
    %c0_38 = arith.constant 0 : index
    %52 = vector.load %arg12[%c0_36, %c0_37, %c0_38] : memref<1x8x32xbf16, #tpu.memory_space<vmem>>, vector<1x8x32xbf16>
    %53 = vector.shape_cast %52 : vector<1x8x32xbf16> to vector<8x32xbf16>
    %cst_39 = arith.constant dense<0.000000e+00> : vector<8x32xf32>
    %54 = tpu.matmul %51, %53, %cst_39 {dimension_numbers = #tpu.dot_dimension_numbers<[1], [0], [0], [1], [0, 0, 1, 1], [], []>} : vector<8x8xbf16>, vector<8x32xbf16>, vector<8x32xf32> -> vector<8x32xf32>
    %55 = arith.addf %50, %54 : vector<8x32xf32>
    %c0_40 = arith.constant 0 : index
    %c0_41 = arith.constant 0 : index
    %56 = vector.load %arg15[%c0_40, %c0_41] : memref<8x32xf32, #tpu.memory_space<vmem>>, vector<8x32xf32>
    tpu.vector_store %arg15[%c0_40, %c0_41], %55 {strides = array<i32>} : memref<8x32xf32, #tpu.memory_space<vmem>>, vector<8x32xf32>,
    %c3_i32 = arith.constant 3 : i32
    %57 = arith.cmpi eq, %arg2, %c3_i32 : i32
    %58 = arith.extui %57 : i1 to i32
    %c0_i32_42 = arith.constant 0 : i32
    %59 = arith.cmpi ne, %58, %c0_i32_42 : i32
    scf.if %59 {
      %c0_43 = arith.constant 0 : index
      %c0_44 = arith.constant 0 : index
      %60 = vector.load %arg15[%c0_43, %c0_44] : memref<8x32xf32, #tpu.memory_space<vmem>>, vector<8x32xf32>
      %c0_45 = arith.constant 0 : index
      %c0_46 = arith.constant 0 : index
      %61 = vector.load %arg13[%c0_45, %c0_46] : memref<1x32xf32, #tpu.memory_space<vmem>>, vector<1x32xf32>
      %62 = vector.broadcast %61 : vector<1x32xf32> to vector<8x32xf32>
      %63 = arith.addf %60, %62 : vector<8x32xf32>
      %c0_47 = arith.constant 0 : index
      %c0_48 = arith.constant 0 : index
      %c0_49 = arith.constant 0 : index
      %64 = vector.load %arg14[%c0_47, %c0_48, %c0_49] : memref<1x8x32xf32, #tpu.memory_space<vmem>>, vector<1x8x32xf32>
      %65 = vector.shape_cast %64 : vector<1x8x32xf32> to vector<8x32xf32>
      %66 = vector.shape_cast %63 : vector<8x32xf32> to vector<1x8x32xf32>
      tpu.vector_store %arg14[%c0_47, %c0_48, %c0_49], %66 {strides = array<i32>} : memref<1x8x32xf32, #tpu.memory_space<vmem>>, vector<1x8x32xf32>,
    } else {
    }
    return
  }
  func.func @transform_0(%arg0: i32, %arg1: i32, %arg2: i32) -> (i32, i32, i32) {
    %c0_i32 = arith.constant 0 : i32
    %c0_i32_0 = arith.constant 0 : i32
    return %arg0, %arg1, %c0_i32 : i32, i32, i32
  }
  func.func @transform_1(%arg0: i32, %arg1: i32, %arg2: i32) -> (i32, i32, i32) {
    %c0_i32 = arith.constant 0 : i32
    %c0_i32_0 = arith.constant 0 : i32
    %c0_i32_1 = arith.constant 0 : i32
    return %arg0, %c0_i32, %c0_i32_0 : i32, i32, i32
  }
  func.func @transform_2(%arg0: i32, %arg1: i32, %arg2: i32) -> (i32, i32, i32) {
    %c0_i32 = arith.constant 0 : i32
    %c0_i32_0 = arith.constant 0 : i32
    %c0_i32_1 = arith.constant 0 : i32
    return %arg0, %c0_i32, %c0_i32_0 : i32, i32, i32
  }
  func.func @transform_3(%arg0: i32, %arg1: i32, %arg2: i32) -> (i32, i32, i32) {
    %c0_i32 = arith.constant 0 : i32
    %c0_i32_0 = arith.constant 0 : i32
    %c0_i32_1 = arith.constant 0 : i32
    return %arg2, %c0_i32, %c0_i32_0 : i32, i32, i32
  }
  func.func @transform_4(%arg0: i32, %arg1: i32, %arg2: i32) -> (i32, i32, i32) {
    %c0_i32 = arith.constant 0 : i32
    %c0_i32_0 = arith.constant 0 : i32
    %c0_i32_1 = arith.constant 0 : i32
    return %arg2, %c0_i32, %c0_i32_0 : i32, i32, i32
  }
  func.func @transform_5(%arg0: i32, %arg1: i32, %arg2: i32) -> (i32, i32, i32) {
    %c0_i32 = arith.constant 0 : i32
    %c0_i32_0 = arith.constant 0 : i32
    %c0_i32_1 = arith.constant 0 : i32
    return %arg2, %c0_i32, %c0_i32_0 : i32, i32, i32
  }
  func.func @transform_6(%arg0: i32, %arg1: i32, %arg2: i32) -> (i32, i32, i32) {
    %c0_i32 = arith.constant 0 : i32
    %c0_i32_0 = arith.constant 0 : i32
    %c0_i32_1 = arith.constant 0 : i32
    return %arg2, %c0_i32, %c0_i32_0 : i32, i32, i32
  }
  func.func @transform_7(%arg0: i32, %arg1: i32, %arg2: i32) -> (i32, i32, i32) {
    %c0_i32 = arith.constant 0 : i32
    %c0_i32_0 = arith.constant 0 : i32
    %c0_i32_1 = arith.constant 0 : i32
    return %arg2, %c0_i32, %c0_i32_0 : i32, i32, i32
  }
  func.func @transform_8(%arg0: i32, %arg1: i32, %arg2: i32) -> (i32, i32, i32) {
    %c0_i32 = arith.constant 0 : i32
    %c0_i32_0 = arith.constant 0 : i32
    %c0_i32_1 = arith.constant 0 : i32
    return %arg2, %c0_i32, %c0_i32_0 : i32, i32, i32
  }
  func.func @transform_9(%arg0: i32, %arg1: i32, %arg2: i32) -> (i32, i32, i32) {
    %c0_i32 = arith.constant 0 : i32
    %c0_i32_0 = arith.constant 0 : i32
    %c0_i32_1 = arith.constant 0 : i32
    return %arg2, %c0_i32, %c0_i32_0 : i32, i32, i32
  }
  func.func @transform_10(%arg0: i32, %arg1: i32, %arg2: i32) -> (i32, i32) {
    %c0_i32 = arith.constant 0 : i32
    %c0_i32_0 = arith.constant 0 : i32
    %c0_i32_1 = arith.constant 0 : i32
    return %c0_i32, %c0_i32_0 : i32, i32
  }
  func.func @transform_11(%arg0: i32, %arg1: i32, %arg2: i32) -> (i32, i32, i32) {
    %c0_i32 = arith.constant 0 : i32
    %c0_i32_0 = arith.constant 0 : i32
    return %arg0, %arg1, %c0_i32 : i32, i32, i32
  }
}

</mosaic_0001>

<bundles_post_ra>
// kernel: tpu_custom_call.1
= control target key start
LH: loop header
LB: loop body
LE: loop exit
PB: predicated region body
PF: predicated region fallthrough
CT: control target
= control target key end

     0   :  { %s1711_s0 = inlined_call_operand.vmem [shape: f32[2,8,32], index: 0, kind: input, shape index: {}]   ;;  %s1712_s1 = inlined_call_operand.vmem [shape: f32[2,8,32], index: 1, kind: input, shape index: {}]   ;;  %s1713_s2 = inlined_call_operand.vmem [shape: f32[2,8,32], index: 2, kind: input, shape index: {}]   ;;  %s1714_s3 = inlined_call_operand.vmem [shape: bf16[4,32,8], index: 3, kind: input, shape index: {}]   ;;  %s1715_s4 = inlined_call_operand.vmem [shape: f32[4,1,8], index: 4, kind: input, shape index: {}]   ;;  %s1716_s5 = inlined_call_operand.vmem [shape: bf16[4,32,8], index: 5, kind: input, shape index: {}]   ;;  %s1717_s6 = inlined_call_operand.vmem [shape: f32[4,1,8], index: 6, kind: input, shape index: {}]   ;;  %s1718_s7 = inlined_call_operand.vmem [shape: bf16[4,32,8], index: 7, kind: input, shape index: {}]   ;;  %s1719_s8 = inlined_call_operand.vmem [shape: f32[4,1,8], index: 8, kind: input, shape index: {}]   ;;  %s1720_s9 = inlined_call_operand.vmem [shape: bf16[4,8,32], index: 9, kind: input, shape index: {}]   ;;  %s1721_s10 = inlined_call_operand.vmem [shape: f32[1,32], index: 10, kind: input, shape index: {}]   ;;  %s1722_s11 = inlined_call_operand.hbm [shape: f32[2,8,32], index: 11, kind: output, shape index: {}]  }
   0x1   :  { %1735 = sst [smem:[#allocation16_spill]] %s1722_s11 }
   0x2   :  { %16 = vsyncpa [#allocation4], 0 }
   0x3   :  { %18 = vsyncpa [#allocation4 + $0x1], 0  ;;  %s1486_s17 = smov 0   ;;  %s1488_s18 = smov 0  }
   0x4   :  { %s1490_s19 = smov 0   ;;  %s1492_s20 = smov 0  }
   0x5   :  { %s1494_s21 = smov 0   ;;  %s1496_s22 = smov 0  }
   0x6   :  { %s1498_s23 = smov 0   ;;  %s1500_s24 = smov 0  }
   0x7 LB: > { %1736 = sst [smem:[#allocation6_spill]] %s1392_s17  ;;  %s1144_s25 = sadd.s32 4294967295, %s1420_s24   ;;  %s1420_s24 = sphi %s1500_s24, %s24_s24   ;;  %s1416_s23 = sphi %s1498_s23, %s1760_s23   ;;  %s1412_s22 = sphi %s1496_s22, %s1759_s22   ;;  %s1408_s21 = sphi %s1494_s21, %s1758_s21   ;;  %s1404_s20 = sphi %s1492_s20, %s1757_s20   ;;  %s1400_s19 = sphi %s1490_s19, %s1756_s19   ;;  %s1396_s18 = sphi %s1488_s18, %s1762_s18   ;;  %s1392_s17 = sphi %s1486_s17, %s1761_s17  }
   0x8   : > { %1737 = sst [smem:[#allocation7_spill]] %s1400_s19  ;;  %s1145_s26 = sadd.s32 4294967294, %s1420_s24  }
   0x9   : > { %1738 = sst [smem:[#allocation8_spill]] %s1412_s22  ;;  %s36_s27 = sadd.s32 1, %s1412_s22 }
   0xa   : > { %1739 = sst [smem:[#allocation9_spill]] %s1416_s23  ;;  %p37_p0 = scmp.ge.s32.totalorder %s36_s27, 4 }
   0xb   : > { %1740 = sst [smem:[#allocation10_spill]] %s1420_s24  ;;  %s43_s28 = sadd.s32 1, %s1416_s23 }
   0xc   : > { %p345_p1 = scmp.ne.s32.totalorder %s1400_s19, %s1396_s18  ;;  %p346_p2 = scmp.eq.s32.totalorder %s1144_s25, 7 }
   0xd   : > { %s1764_s27 = smov (%p37_p0, %s36_s27), 0  ;;  %s1766_s28 = smov (!%p37_p0, %s43_s28), %s1416_s23 }
   0xe   : > { %1741 = sst [smem:[#allocation11_spill]] %s1764_s27  ;;  %p1535_p3 = por %p346_p2, %p345_p1 }
   0xf   : > { %p351_p4 = scmp.ne.s32.totalorder %s1396_s18, %s1392_s17  ;;  %p45_p5 = scmp.ge.s32.totalorder %s1766_s28, 2 }
  0x10   : > { %s1742_s29 = scalar_select %p1535_p3, 1, 0 }
  0x11   : > { %p352_p6 = scmp.eq.s32.totalorder %s1145_s26, 7  ;;  %p1148_p7 = scmp.ge.s32.totalorder %s1420_s24, 1 }
  0x12   : > { %1743 = sst [smem:[#allocation12_spill]] %s1742_s29  ;;  %p446_p8 = scmp.lt.s32.totalorder %s1420_s24, 9 }
  0x13   : > { %s1768_s28 = smov (%p45_p5, %s1766_s28), 0  ;;  %p1545_p9 = por %p352_p6, %p351_p4 }
  0x14   : > { %1744 = sst [smem:[#allocation13_spill]] %s1768_s28  ;;  %p447_p10 = pnand %p1148_p7, %p446_p8 }
  0x15   : > { %s1745_s30 = scalar_select %p1545_p9, 1, 0 }
  0x16   : > { %s330_s12 = ssub.s32 %s1416_s23, %s1768_s28  ;;  %s335_s13 = sadd.s32 1, %s1400_s19  ;;  %v1422_v0 = vmov (!%p447_p10), 0.0   ;;  %vm1423_vm0 = vmmov (!%p447_p10), 0   ;;  %vm597_vm1 = vcmask (!%p447_p10), 261120   ;;  %vm775_vm2 = vcmask (!%p447_p10), 64512  }
  0x17   : > { %1746 = sst [smem:[#allocation14_spill]] %s1745_s30  ;;  %p333_p11 = scmp.eq.s32.totalorder %s330_s12, 0  ;;  %1208 = vmatprep.subr.bf16.mxu1 (!%p447_p10), %v1422_v0  ;;  %1200 = vmatprep.subr.bf16.mxu0 (!%p447_p10), %v1422_v0  ;;  %vm839_vm3 = vcmask (!%p447_p10), 1043456  }
  0x18   : > { %450 = sbr.rel (%p447_p10) target bundleno = 1269 (0x4f5), region = 64  ;;  %p539_p12 = scmp.lt.s32.totalorder (!%p447_p10), %s1404_s20, 3  ;;  %1212 = vmatprep.mubr.msk.bf16.mxu1 (!%p447_p10), %vm1423_vm0, %v1422_v0  ;;  %1204 = vmatprep.mubr.msk.bf16.mxu0 (!%p447_p10), %vm1423_vm0, %v1422_v0 }
  0x19   : > { %s1553_s14 = scalar_select %p333_p11, %s1400_s19, %s335_s13  }
  0x1a   : > { %s1724_s15 = sand.u32 (!%p447_p10), 1, %s1396_s18   ;;  %p524_p13 = scmp.lt.s32.totalorder (!%p447_p10), %s1408_s21, 1 }
  0x1b   : > { %1747 = sst [smem:[#allocation15_spill]] %s1553_s14  ;;  %s1560_s16 = sshll.u32 (!%p447_p10), %s1724_s15, 3 }
  0x1c   : > { %p1174_p0 = scmp.ne.s32.totalorder (!%p447_p10), %s1404_s20, 0 }
  0x1f   : > { %s1564_s25 = scalar_select %p539_p12, %s1404_s20, 3 }
  0x20   : > { %s525_s17 = scalar_select %p524_p13, %s1408_s21, 1 }
  0x21   : > { %s1182_s26 = sshll.u32 %s1564_s25, 4  ;;  %s1159_s12 = sshll.u32 %s1564_s25, 2  ;;  %v1424_v55 = vmov (!%p1174_p0), 0.0  }
  0x22   : > { %s551_s15 = scalar_lea.vmem %s1716_s5, %s1182_s26  ;;  %s1579_s22 = scalar_lea.vmem %s1720_s9, %s1159_s12  ;;  %887 = vst.msk [vmem:[#allocation2] sm:$0xff] (!%p1174_p0), %vm597_vm1, %v1424_v55 }
  0x23   : > { %v1316_v1 = vld [vmem:[%s551_s15] sm:$0xff]   ;;  %s543_s30 = scalar_lea.vmem %s1714_s3, %s1182_s26  ;;  %v1317_v2 = vld [vmem:[%s551_s15 + $0x8] sm:$0xff]   ;;  %s1588_s29 = scalar_lea.vmem %s1718_s7, %s1182_s26 }
  0x24   : > { %1209 = vmatpush3.bf16.msra.mxu1 %v1316_v1  ;;  %v1318_v3 = vld [vmem:[%s543_s30] sm:$0xff]   ;;  %s1591_s28 = sshll.u32 %s525_s17, 3  ;;  %v1319_v4 = vld [vmem:[%s543_s30 + $0x8] sm:$0xff]   ;;  %s554_s24 = scalar_lea.vmem %s1717_s6, %s1564_s25 }
  0x25   : > { %1210 = vmatprep.subr.bf16.mxu1 %v1422_v0  ;;  %1201 = vmatpush3.bf16.msra.mxu0 %v1318_v3  ;;  %s534_s19 = scalar_lea.vmem %s1712_s1, %s1591_s28  ;;  %s530_s12 = scalar_lea.vmem %s1711_s0, %s1591_s28  ;;  %v1164_v9 = vld [vmem:[%s554_s24] ss:$0 sm:$0xff]  ;;  %v1321_v25 = vld [vmem:[%s1588_s29 + $0x8] sm:$0xff]  }
  0x26   : > { %v570_v5 = vld [vmem:[%s534_s19] sm:$0xff]  ;;  %1202 = vmatprep.subr.bf16.mxu0 %v1422_v0  ;;  %s546_s13 = scalar_lea.vmem %s1715_s4, %s1564_s25  ;;  %s538_s19 = scalar_lea.vmem %s1713_s2, %s1591_s28 }
  0x27   : > { %v568_v6 = vld [vmem:[%s530_s12] sm:$0xff]  ;;  %v571_v7 = vpack.c.bf16 %v570_v5, %v570_v5  ;;  %s562_s14 = scalar_lea.vmem %s1719_s8, %s1564_s25  ;;  %s523_s25 = scalar_lea.vmem [#allocation3], %s1560_s16 }
  0x28   : > { %1211 = vmatpush3.bf16.msra.mxu1 %v1317_v2  ;;  %v569_v8 = vpack.c.bf16 %v568_v6, %v568_v6  ;;  %v1160_v14 = vld [vmem:[%s546_s13] ss:$0 sm:$0xff] }
  0x29   : > { %1224 = vmatprep.subr.bf16.mxu1 %v1422_v0  ;;  %1203 = vmatpush3.bf16.msra.mxu0 %v1319_v4  ;;  %v1320_v24 = vld [vmem:[%s1588_s29] sm:$0xff]  }
  0x2a   : > { %1216 = vmatprep.subr.bf16.mxu0 %v1422_v0  ;;  %v572_v26 = vld [vmem:[%s538_s19] sm:$0xff] }
  0x2b   : > { %1213 = vmatmul.mubr.msk.bf16.vlgmr.msra.gmra.mrb[0].mxu1 %vm597_vm1, %v571_v7  ;;  %v573_v27 = vpack.c.bf16 %v572_v26, %v572_v26  ;;  %v1168_v42 = vld [vmem:[%s562_s14] ss:$0 sm:$0xff] }
  0x2c   : > { %1226 = vmatprep.mubr.msk.bf16.mxu1 %vm1423_vm0, %v1422_v0  ;;  %1205 = vmatmul.mubr.msk.bf16.vlgmr.msra.gmra.mrb[0].mxu0 %vm597_vm1, %v569_v8 }
  0x2d   : > { %1220 = vmatprep.mubr.msk.bf16.mxu0 %vm1423_vm0, %v1422_v0  ;;  %1217 = vmatpush3.bf16.msra.mxu0 %v1320_v24 }
  0x2e   : > { %1218 = vmatprep.subr.bf16.mxu0 %v1422_v0 }
  0x31   : > { %1219 = vmatpush3.bf16.msra.mxu0 %v1321_v25 }
  0x32   : > { %1230 = vmatprep.subr.bf16.mxu0 %v1422_v0 }
  0x34   : > { %1221 = vmatmul.mubr.msk.bf16.vlgmr.msra.gmra.mrb[4].mxu0 %vm597_vm1, %v573_v27 }
  0x35   : > { %1232 = vmatprep.mubr.msk.bf16.mxu0 %vm1423_vm0, %v1422_v0 }
  0xfe   : > { %v701_v10 = vpop.f32.mrb[0].mxu1 }
  0xff   : > { %v702_v11 = vadd.f32 %v1164_v9, %v701_v10  ;;  %v1214_v12 = vpop.f32.mrb[1].mxu1  ;;  %v635_v15 = vpop.f32.mrb[0].mxu0 }
 0x100   : > { %v704_v13 = vpop.f32.mrb[2].mxu1  ;;  %v1206_v18 = vpop.f32.mrb[1].mxu0  ;;  %v636_v21 = vadd.f32 %v1160_v14, %v635_v15 }
 0x101   : > { %v774_v16 = vpack.c.bf16 %v702_v11, %v702_v11  ;;  %v1215_v17 = vpop.f32.mrb[3].mxu1  ;;  %v638_v19 = vpop.f32.mrb[2].mxu0 }
 0x102   : > { %v1207_v22 = vpop.f32.mrb[3].mxu0  ;;  %v773_v23 = vpack.c.bf16 %v636_v21, %v636_v21 }
 0x103   : > { %v780_v20 = vsel %vm775_vm2, %v774_v16, 0 }
 0x104   : > { %1225 = vmatpush3.bf16.xpose.msra.mxu1 %v780_v20 }
 0x107   : > { %v767_v39 = vpop.f32.mrb[4].mxu0 }
 0x108   : > { %v1222_v40 = vpop.f32.mrb[5].mxu0  ;;  %v768_v44 = vadd.f32 %v1168_v42, %v767_v39 }
 0x109   : > { %v770_v41 = vpop.f32.mrb[6].mxu0 }
 0x10a   : > { %v1223_v43 = vpop.f32.mrb[7].mxu0  ;;  %v835_v45 = vpack.c.bf16 %v768_v44, %v768_v44 }
 0x10b   : > { %1227 = vmatmul.mubr.msk.bf16.vlgmr.msra.gmra.mrb[4].mxu1 %vm775_vm2, %v773_v23 }
 0x10c   : > { %v841_v46 = vsel %vm839_vm3, %v835_v45, 0 }
 0x10d   : > { %1231 = vmatpush3.bf16.msra.mxu0 %v841_v46 }
 0x1de   : > { %v816_v28 = vpop.f32.mrb[4].mxu1 }
 0x1df   : > { %v822_v29 = vmul.f32 0.35355338, %v816_v28  ;;  %v1228_v30 = vpop.f32.mrb[5].mxu1 }
 0x1e0   : > { %v819_v31 = vpop.f32.mrb[6].mxu1 }
 0x1e1   : > { %v1229_v32 = vpop.f32.mrb[7].mxu1  ;;  %v823_v33 = vsel %vm775_vm2, %v822_v29, -inf }
 0x1e2   : > { %824 = vmax.xlane.f32.xlu0 %v823_v33 }
 0x26f   : > { %v825_v34 = vpop.xlane.xlu0 %824 }
 0x270   : > { %v826_v35 = vsub.f32 %v822_v29, %v825_v34 }
 0x272   : > { %v827_v36 = vmul.f32 1.442695, %v826_v35 }
 0x274   : > { %1322 = vpow2.f32 %v827_v36 }
 0x27e   : > { %v1323_v37 = vpop.eup %1322 }
 0x27f   : > { %v829_v38 = vsel %vm775_vm2, %v1323_v37, 0.0 }
 0x280   : > { %830 = vadd.xlane.f32.xlu0 %v829_v38 }
 0x30d   : > { %v831_v47 = vpop.xlane.xlu0 %830 }
 0x30e   : > { %1324 = vrcp.f32 %v831_v47 }
 0x318   : > { %v1325_v48 = vpop.eup %1324 }
 0x319   : > { %v833_v49 = vmul.f32 %v1325_v48, %v1323_v37 }
 0x31b   : > { %v834_v50 = vpack.c.bf16 %v833_v49, %v833_v49 }
 0x31d   : > { %1233 = vmatmul.mubr.msk.bf16.vlgmr.msra.gmra.mrb[8].mxu0 %vm775_vm2, %v834_v50 }
 0x3ed   : > { %886 = sbr.rel (%p1174_p0) target bundleno = 1012 (0x3f4), region = 68 }
 0x3f0   : > { %v877_v51 = vpop.f32.mrb[8].mxu0 }
 0x3f1   : > { %v1234_v52 = vpop.f32.mrb[9].mxu0 }
 0x3f2   : > { %v880_v53 = vpop.f32.mrb[10].mxu0 }
 0x3f3   : > { %v1235_v54 = vpop.f32.mrb[11].mxu0 }
 0x3f4 PF: > { %1236 = vmatprep.subr.bf16.mxu1 %v1422_v0  ;;  %v890_v56 = vld [vmem:[%s1579_s22] sm:$0xf]  ;;  %1238 = vmatprep.mubr.msk.bf16.mxu1 %vm1423_vm0, %v1422_v0  ;;  %v889_v58 = vpack.c.bf16 %v877_v51, %v877_v51  ;;  %p1176_p1 = scmp.ne.s32.totalorder %s1404_s20, 3 }
 0x3f5   : > { %v895_v57 = vsel %vm839_vm3, %v890_v56, 0  ;;  %v888_v59 = vld [vmem:[#allocation2] sm:$0xff] }
 0x3f6   : > { %1237 = vmatpush3.bf16.msra.mxu1 %v895_v57  ;;  %v1177_v0 = vld [vmem:[%s1721_s10] ss:$0 sm:$0xff] (!%p1176_p1) }
 0x3f9   : > { %1239 = vmatmul.mubr.msk.bf16.vlgmr.msra.gmra.mrb[8].mxu1 %vm775_vm2, %v889_v58 }
 0x4c9   : > { %942 = sbr.rel (%p1176_p1) target bundleno = 1242 (0x4da), region = 72 }
 0x4cc   : > { %v931_v60 = vpop.f32.mrb[8].mxu1 }
 0x4cd   : > { %v937_v61 = vadd.f32 %v931_v60, %v888_v59  ;;  %v1240_v62 = vpop.f32.mrb[9].mxu1 }
 0x4ce   : > { %v934_v63 = vpop.f32.mrb[10].mxu1 }
 0x4cf   : > { %938 = vst.msk [vmem:[#allocation2] sm:$0xff] %vm597_vm1, %v937_v61  ;;  %v1241_v1 = vpop.f32.mrb[11].mxu1 }
 0x4d6   : > { %v943_v2 = vld [vmem:[#allocation2] sm:$0xff] }
 0x4d7   : > { %v951_v3 = vadd.f32 %v1177_v0, %v943_v2 }
 0x4d9   : > { %952 = vst.msk [vmem:[%s523_s25] sm:$0xff] %vm597_vm1, %v951_v3 }
 0x4da PF: > { %s1179_s11 = sshll.u32 %s1408_s21, 7  ;;  %s1749_s20 = sld [smem:[#allocation16_spill]] }
 0x4db   : > { %s968_s13 = sshll.u32 %s523_s25, 4  ;;  %s1751_s23 = sand.u32 1, %s1396_s18   ;;  %s969_s13 = int_to_ptr.vmem [resolvable:$true] %s968_s13 }
 0x4dc   : > { %s954_s27 = scalar_lea.sflag [#allocation4], %s1751_s23  ;;  %s1326_s19 = scalar_lea.vmem %s969_s13, 128 }
 0x4dd   : > { %p1327_p2 = scmp.ne.s32.totalorder %s969_s13, %s1326_s19  ;;  %s1425_s29 = smov [#allocation3]  }
 0x4de   : > { %s1330_s28 = sshll.u32 %s1425_s29, 4  ;;  %s1331_s28 = int_to_ptr.vmem [resolvable:$false] %s1330_s28 }
 0x4df   : > { %p1328_p4 = pnand %p1327_p2, %p1535_p3  ;;  %s1332_s14 = scalar_lea.vmem %s1331_s28, 256 }
 0x4e0   : > { %s1750_s30 = smov %s1749_s20  ;;  %s1660_s26 = scalar_lea.hbm %s1749_s20, %s1179_s11 }
 0x4e1   : > { %p1329_p5 = pneg %p1328_p4  ;;  %p1333_p6 = scmp.lt.s32.totalorder %s969_s13, %s1331_s28 }
 0x4e2   : > { %p1334_p7 = scmp.lt.s32.totalorder %s1332_s14, %s1326_s19 }
 0x4e4   : > { %p1335_p8 = por %p1334_p7, %p1333_p6 }
 0x4e6   : > { %p1336_p10 = pnand %p1335_p8, %p1329_p5 }
 0x4e8   : > { %1339 = shalt.err (!%p1336_p10)
}
 0x4e9   : > { %s1340_s21 = scalar_lea.hbm %s1660_s26, 128  ;;  %s1344_s22 = scalar_lea.hbm %s1750_s30, 256 }
 0x4ea   : > { %p1341_p11 = scmp.ne.s32.totalorder %s1660_s26, %s1340_s21  ;;  %p1345_p0 = scmp.lt.u32.totalorder %s1660_s26, %s1750_s30 }
 0x4eb   : > { %p1346_p1 = scmp.lt.u32.totalorder %s1344_s22, %s1340_s21  ;;  %p1348_p4 = scmp.lt.u32.totalorder %s1340_s21, %s1660_s26 }
 0x4ec   : > { %p1342_p12 = pnand %p1341_p11, %p1535_p3 }
 0x4ed   : > { %p1347_p2 = por %p1346_p1, %p1345_p0 }
 0x4ee   : > { %p1343_p13 = pneg %p1342_p12 }
 0x4ef   : > { %p1349_p5 = por %p1348_p4, %p1347_p2 }
 0x4f1   : > { %p1350_p6 = pnand %p1349_p5, %p1343_p13 }
 0x4f3   : > { %1353 = shalt.err (!%p1350_p6)
}
 0x4f4   : > { %1242 = dma.vmem_to_hbm [thread:$0]  (%p1535_p3), %s969_s13, 128, %s1660_s26, %s954_s27  }
 0x4f5 PF: > { %s1752_s17 = sld [smem:[#allocation10_spill]]  ;;  %s1753_s24 = sld [smem:[#allocation6_spill]] }
 0x4fb   : > { %p1248_p7 = scmp.ge.s32.totalorder %s1752_s17, 2  ;;  %s980_s23 = sand.u32 1, %s1753_s24  }
 0x4fc   : > { %s981_s19 = scalar_lea.sflag [#allocation4], %s980_s23 }
 0x4fd   : > { %p1245_p8 = pnand %p1248_p7, %p1545_p9 }
 0x4ff   : > { %1387 = dma.done.wait (!%p1245_p8), %s981_s19, 128  }
 0x500   : > { %1389 = vsyncadd (!%p1245_p8), %s981_s19, 4294967168  ;;  %s24_s24 = sadd.s32 1, %s1752_s17   ;;  %s1755_s29 = sld [smem:[#allocation7_spill]] }
 0x501   : > { %p21_p10 = scmp.ge.s32.totalorder %s24_s24, 10   ;;  %s1756_s19 = sld [smem:[#allocation15_spill]] }
 0x502   : > { %s1757_s20 = sld [smem:[#allocation8_spill]]  ;;  %s1758_s21 = sld [smem:[#allocation9_spill]] }
 0x503   : > { %s1759_s22 = sld [smem:[#allocation11_spill]]  ;;  %s1760_s23 = sld [smem:[#allocation13_spill]] }
 0x504   : > { %s1761_s17 = smov %s1396_s18  ;;  %23 = sbr.rel (!%p21_p10) target bundleno = 7 (0x7), region = 134 }
 0x506   : > { %s1762_s18 = smov %s1755_s29 }
 0x50b   :  { %986 = vsyncpa [#allocation4], 1 }
 0x50c   :  { %988 = vsyncpa [#allocation4 + $0x1], 1 }

</bundles_post_ra>
